<compile_context>
chip_gen: v7x
topology: tpu7x:2x2x1
jax: 0.10.0
libtpu: 0.0.40
codegen_flags: <defaults>
</compile_context>

<pallas_src>
import functools

import jax
import jax.numpy as jnp
from jax.experimental import pallas as pl
from jax.experimental.pallas import tpu as pltpu


_DEFAULT_TILE_ROWS_PACKED = 256   # packed rows per grid step (= 256*P original rows)
_DEFAULT_MIN_KERNEL_ROWS = 64     # below this batch, plain XLA beats the custom call


def _round_up(n, m):
    return ((n + m - 1) // m) * m


def _device_kind():
    try:
        return jax.devices()[0].device_kind.lower()
    except Exception:
        return ""


def _default_pack_factor():
    """P=8 for 256x256 MXUs (v6e/v7x), P=4 for 128x128 MXUs (v5e and older)."""
    kind = _device_kind()
    if any(t in kind for t in ("v6", "6e", "v7", "7x")):
        return 8
    if any(t in kind for t in ("v2", "v3", "v4", "v5")):
        return 4
    return 8


def _num_tensorcores():
    kind = _device_kind()
    if any(t in kind for t in ("v4", "v5p", "7")):
        return 2
    return 1


def _deep_kernel(x_ref,
                 w1_ref, b1_ref, w2_ref, b2_ref,
                 w3_ref, b3_ref, w4_ref, b4_ref,
                 o_ref):
    # bf16 inputs to the MXU, f32 accumulation via preferred_element_type.
    # Bias-add / ReLU stay in f32 (correct on all gens; v5e has no bf16 VPU).
    h = x_ref[...].astype(jnp.bfloat16)

    h = jnp.dot(h, w1_ref[...], preferred_element_type=jnp.float32) + b1_ref[...]
    h = jnp.maximum(h, 0.0).astype(jnp.bfloat16)

    h = jnp.dot(h, w2_ref[...], preferred_element_type=jnp.float32) + b2_ref[...]
    h = jnp.maximum(h, 0.0).astype(jnp.bfloat16)

    h = jnp.dot(h, w3_ref[...], preferred_element_type=jnp.float32) + b3_ref[...]
    h = jnp.maximum(h, 0.0).astype(jnp.bfloat16)

    h = jnp.dot(h, w4_ref[...], preferred_element_type=jnp.float32) + b4_ref[...]

    # With packing the last dim is P*out (128 lanes at P=8) -> unmasked vst.
    o_ref[...] = h.astype(o_ref.dtype)


def prepare_params(params, pack=None):
    """One-time conversion of PyTorch-layout params to kernel layout.

    params: list of (weight (out,in), bias (out,)) pairs in PyTorch layout.
    Returns dict:
      'pack'   : packing factor P (static Python int)
      'packed' : tuple of (block-diag W (P*in, P*out) bf16, bias (1, P*out) f32)
      'plain'  : tuple of ((in, out) f32, (1, out) f32) for the XLA small-batch fallback
    """
    if pack is None:
        pack = _default_pack_factor()
    pack = int(pack)

    packed, plain = [], []
    for w_pt, b_pt in params:
        w = jnp.asarray(w_pt, jnp.float32).T            # (in, out)
        b = jnp.asarray(b_pt, jnp.float32)               # (out,)
        fan_in, fan_out = w.shape

        w_big = jnp.zeros((pack * fan_in, pack * fan_out), jnp.float32)
        for p in range(pack):
            w_big = w_big.at[p * fan_in:(p + 1) * fan_in,
                             p * fan_out:(p + 1) * fan_out].set(w)
        packed.append((w_big.astype(jnp.bfloat16), jnp.tile(b, pack)[None, :]))
        plain.append((w, b[None, :]))

    return {"pack": pack, "packed": tuple(packed), "plain": tuple(plain)}


@functools.partial(
    jax.jit,
    static_argnames=("pack", "tile_rows", "min_kernel_rows", "out_dtype"))
def _deep_forward_impl(x, packed_layers, plain_layers, *,
                       pack, tile_rows, min_kernel_rows, out_dtype):
    batch, in_size = x.shape
    out_size = plain_layers[-1][0].shape[1]

    # ---- small-batch fallback: custom-call / pipeline overhead dominates ----
    if batch < min_kernel_rows:
        h = x
        n = len(plain_layers)
        for i, (w, b) in enumerate(plain_layers):
            h = jnp.dot(h, w, preferred_element_type=jnp.float32) + b
            if i < n - 1:
                h = jnp.maximum(h, 0.0)
        return h.astype(out_dtype)

    kp_in = pack * in_size
    kp_out = pack * out_size

    # ---- pack P rows into the lane dim; pad so the grid divides evenly ----
    packed_rows = _round_up(batch, pack) // pack
    tb = _round_up(min(tile_rows, _round_up(packed_rows, 8)), 8)
    padded_rows = _round_up(packed_rows, tb)
    n_tiles = padded_rows // tb

    # Prefer an even tile count on 2-TC chips so the "parallel" batch axis
    # shards across both TensorCores.
    if _num_tensorcores() >= 2 and n_tiles % 2 == 1 and tb % 16 == 0:
        tb //= 2
        n_tiles = padded_rows // tb

    padded_batch = padded_rows * pack
    if padded_batch != batch:
        x = jnp.pad(x, ((0, padded_batch - batch), (0, 0)))
    xp = x.reshape(padded_rows, kp_in)   # row-major: P consecutive rows per packed row

    x_spec = pl.BlockSpec((tb, kp_in), lambda i: (i, 0))
    o_spec = pl.BlockSpec((tb, kp_out), lambda i: (i, 0))

    def _resident(shape):
        # Constant index_map -> block is VMEM-resident across the whole grid.
        return pl.BlockSpec(shape, lambda i: (0, 0))

    in_specs = [x_spec]
    flat_args = [xp]
    for w, b in packed_layers:
        in_specs += [_resident(w.shape), _resident(b.shape)]
        flat_args += [w, b]

    flops = 2 * padded_rows * kp_in * (3 * kp_in + kp_out)
    bytes_accessed = (
        padded_rows * kp_in * 4
        + padded_rows * kp_out * jnp.dtype(out_dtype).itemsize
        + sum(w.size * 2 + b.size * 4 for w, b in packed_layers))

    out_packed = pl.pallas_call(
        _deep_kernel,
        out_shape=jax.ShapeDtypeStruct((padded_rows, kp_out), out_dtype),
        grid=(n_tiles,),
        in_specs=in_specs,
        out_specs=o_spec,
        compiler_params=pltpu.CompilerParams(
            dimension_semantics=("parallel",),      # dual-TC sharding where available
            vmem_limit_bytes=32 * 1024 * 1024,      # headroom for larger tile sweeps
        ),
        cost_estimate=pl.CostEstimate(
            flops=flops, transcendentals=0, bytes_accessed=bytes_accessed),
    )(*flat_args)

    out = out_packed.reshape(padded_batch, out_size)
    if padded_batch != batch:
        out = out[:batch]
    return out


def deep_forward(x, prepared, *,
                 tile_rows=_DEFAULT_TILE_ROWS_PACKED,
                 min_kernel_rows=_DEFAULT_MIN_KERNEL_ROWS,
                 out_dtype=jnp.float32):
    """x: (batch, input_size) f32.  prepared: output of prepare_params()."""
    return _deep_forward_impl(
        x, prepared["packed"], prepared["plain"],
        pack=prepared["pack"], tile_rows=tile_rows,
        min_kernel_rows=min_kernel_rows, out_dtype=out_dtype)


def _init_linear(key, fan_in, fan_out):
    """Deterministic init mimicking PyTorch's default uniform(-1/sqrt(fan_in), ...)."""
    kw, kb = jax.random.split(key)
    bound = 1.0 / jnp.sqrt(jnp.float32(fan_in))
    w = jax.random.uniform(kw, (fan_out, fan_in), jnp.float32, -bound, bound)  # PT layout
    b = jax.random.uniform(kb, (fan_out,), jnp.float32, -bound, bound)
    return w, b


def deep_reference(x, params):
    """Plain-JAX f32 reference of the PyTorch forward."""
    h = x
    for i, (w_pt, b_pt) in enumerate(params):
        h = h @ jnp.asarray(w_pt, jnp.float32).T + jnp.asarray(b_pt, jnp.float32)
        if i < len(params) - 1:
            h = jnp.maximum(h, 0.0)
    return h


if __name__ == "__main__":
    input_size = 32
    output_size = 16

    root = jax.random.PRNGKey(0)
    kx, k1, k2, k3, k4, kx_small = jax.random.split(root, 6)

    params = [
        _init_linear(k1, input_size, input_size),
        _init_linear(k2, input_size, input_size),
        _init_linear(k3, input_size, input_size),
        _init_linear(k4, input_size, output_size),
    ]
    prepared = prepare_params(params)   # one-time transpose / block-diag pack / bf16 cast

    # Main test: batch large enough to exercise the Pallas kernel path.
    batch = 512
    x = jax.random.normal(kx, (batch, input_size), jnp.float32)
    out = jax.block_until_ready(deep_forward(x, prepared))
    ref = deep_reference(x, params)
    assert out.shape == (batch, output_size)
    # bf16 MXU inputs => relaxed tolerance vs the pure-f32 reference.
    assert jnp.allclose(out, ref, atol=3e-2, rtol=3e-2), "kernel mismatch vs reference"

    # Small-batch path (XLA fallback; module semantics preserved in f32).
    x_small = jax.random.normal(kx_small, (8, input_size), jnp.float32)
    out_small = jax.block_until_ready(deep_forward(x_small, prepared))
    ref_small = deep_reference(x_small, params)
    assert out_small.shape == (8, output_size)
    assert jnp.allclose(out_small, ref_small, atol=1e-4, rtol=1e-4), "fallback mismatch"

    print("KERNEL_OK")
</pallas_src>

<mosaic_0001>
module attributes {stable_mosaic.version = 11 : i64} {
  func.func @_deep_kernel(%arg0: i32, %arg1: memref<64x256xf32, #tpu.memory_space<vmem>>, %arg2: memref<256x256xbf16, #tpu.memory_space<vmem>>, %arg3: memref<1x256xf32, #tpu.memory_space<vmem>>, %arg4: memref<256x256xbf16, #tpu.memory_space<vmem>>, %arg5: memref<1x256xf32, #tpu.memory_space<vmem>>, %arg6: memref<256x256xbf16, #tpu.memory_space<vmem>>, %arg7: memref<1x256xf32, #tpu.memory_space<vmem>>, %arg8: memref<256x128xbf16, #tpu.memory_space<vmem>>, %arg9: memref<1x128xf32, #tpu.memory_space<vmem>>, %arg10: memref<64x128xf32, #tpu.memory_space<vmem>>) attributes {dimension_semantics = [#tpu.dimension_semantics<parallel>], iteration_bounds = array<i64: 1>, scalar_prefetch = 0 : i64, scratch_operands = 0 : i64, tpu.core_type = #tpu.core_type<tc>, window_params = [{transform_indices = @transform_0, window_bounds = array<i64: 64, 256>}, {pipeline_mode = #tpu.pipeline_mode<synchronous>, transform_indices = @transform_1, window_bounds = array<i64: 256, 256>}, {pipeline_mode = #tpu.pipeline_mode<synchronous>, transform_indices = @transform_2, window_bounds = array<i64: 1, 256>}, {pipeline_mode = #tpu.pipeline_mode<synchronous>, transform_indices = @transform_3, window_bounds = array<i64: 256, 256>}, {pipeline_mode = #tpu.pipeline_mode<synchronous>, transform_indices = @transform_4, window_bounds = array<i64: 1, 256>}, {pipeline_mode = #tpu.pipeline_mode<synchronous>, transform_indices = @transform_5, window_bounds = array<i64: 256, 256>}, {pipeline_mode = #tpu.pipeline_mode<synchronous>, transform_indices = @transform_6, window_bounds = array<i64: 1, 256>}, {pipeline_mode = #tpu.pipeline_mode<synchronous>, transform_indices = @transform_7, window_bounds = array<i64: 256, 128>}, {pipeline_mode = #tpu.pipeline_mode<synchronous>, transform_indices = @transform_8, window_bounds = array<i64: 1, 128>}, {transform_indices = @transform_9, window_bounds = array<i64: 64, 128>}]} {
    %c0 = arith.constant 0 : index
    %c0_0 = arith.constant 0 : index
    %0 = vector.load %arg1[%c0, %c0_0] : memref<64x256xf32, #tpu.memory_space<vmem>>, vector<64x256xf32>
    %1 = arith.truncf %0 : vector<64x256xf32> to vector<64x256xbf16>
    %c0_1 = arith.constant 0 : index
    %c0_2 = arith.constant 0 : index
    %2 = vector.load %arg2[%c0_1, %c0_2] : memref<256x256xbf16, #tpu.memory_space<vmem>>, vector<256x256xbf16>
    %cst = arith.constant dense<0.000000e+00> : vector<64x256xf32>
    %3 = tpu.matmul %1, %2, %cst {dimension_numbers = #tpu.dot_dimension_numbers<[1], [0], [0], [1], [0, 0, 1, 1], [], []>} : vector<64x256xbf16>, vector<256x256xbf16>, vector<64x256xf32> -> vector<64x256xf32>
    %c0_3 = arith.constant 0 : index
    %c0_4 = arith.constant 0 : index
    %4 = vector.load %arg3[%c0_3, %c0_4] : memref<1x256xf32, #tpu.memory_space<vmem>>, vector<1x256xf32>
    %5 = vector.broadcast %4 : vector<1x256xf32> to vector<64x256xf32>
    %6 = arith.addf %3, %5 : vector<64x256xf32>
    %cst_5 = arith.constant 0.000000e+00 : f32
    %7 = vector.broadcast %cst_5 : f32 to vector<64x256xf32>
    %8 = arith.maximumf %6, %7 : vector<64x256xf32>
    %9 = arith.truncf %8 : vector<64x256xf32> to vector<64x256xbf16>
    %c0_6 = arith.constant 0 : index
    %c0_7 = arith.constant 0 : index
    %10 = vector.load %arg4[%c0_6, %c0_7] : memref<256x256xbf16, #tpu.memory_space<vmem>>, vector<256x256xbf16>
    %cst_8 = arith.constant dense<0.000000e+00> : vector<64x256xf32>
    %11 = tpu.matmul %9, %10, %cst_8 {dimension_numbers = #tpu.dot_dimension_numbers<[1], [0], [0], [1], [0, 0, 1, 1], [], []>} : vector<64x256xbf16>, vector<256x256xbf16>, vector<64x256xf32> -> vector<64x256xf32>
    %c0_9 = arith.constant 0 : index
    %c0_10 = arith.constant 0 : index
    %12 = vector.load %arg5[%c0_9, %c0_10] : memref<1x256xf32, #tpu.memory_space<vmem>>, vector<1x256xf32>
    %13 = vector.broadcast %12 : vector<1x256xf32> to vector<64x256xf32>
    %14 = arith.addf %11, %13 : vector<64x256xf32>
    %cst_11 = arith.constant 0.000000e+00 : f32
    %15 = vector.broadcast %cst_11 : f32 to vector<64x256xf32>
    %16 = arith.maximumf %14, %15 : vector<64x256xf32>
    %17 = arith.truncf %16 : vector<64x256xf32> to vector<64x256xbf16>
    %c0_12 = arith.constant 0 : index
    %c0_13 = arith.constant 0 : index
    %18 = vector.load %arg6[%c0_12, %c0_13] : memref<256x256xbf16, #tpu.memory_space<vmem>>, vector<256x256xbf16>
    %cst_14 = arith.constant dense<0.000000e+00> : vector<64x256xf32>
    %19 = tpu.matmul %17, %18, %cst_14 {dimension_numbers = #tpu.dot_dimension_numbers<[1], [0], [0], [1], [0, 0, 1, 1], [], []>} : vector<64x256xbf16>, vector<256x256xbf16>, vector<64x256xf32> -> vector<64x256xf32>
    %c0_15 = arith.constant 0 : index
    %c0_16 = arith.constant 0 : index
    %20 = vector.load %arg7[%c0_15, %c0_16] : memref<1x256xf32, #tpu.memory_space<vmem>>, vector<1x256xf32>
    %21 = vector.broadcast %20 : vector<1x256xf32> to vector<64x256xf32>
    %22 = arith.addf %19, %21 : vector<64x256xf32>
    %cst_17 = arith.constant 0.000000e+00 : f32
    %23 = vector.broadcast %cst_17 : f32 to vector<64x256xf32>
    %24 = arith.maximumf %22, %23 : vector<64x256xf32>
    %25 = arith.truncf %24 : vector<64x256xf32> to vector<64x256xbf16>
    %c0_18 = arith.constant 0 : index
    %c0_19 = arith.constant 0 : index
    %26 = vector.load %arg8[%c0_18, %c0_19] : memref<256x128xbf16, #tpu.memory_space<vmem>>, vector<256x128xbf16>
    %cst_20 = arith.constant dense<0.000000e+00> : vector<64x128xf32>
    %27 = tpu.matmul %25, %26, %cst_20 {dimension_numbers = #tpu.dot_dimension_numbers<[1], [0], [0], [1], [0, 0, 1, 1], [], []>} : vector<64x256xbf16>, vector<256x128xbf16>, vector<64x128xf32> -> vector<64x128xf32>
    %c0_21 = arith.constant 0 : index
    %c0_22 = arith.constant 0 : index
    %28 = vector.load %arg9[%c0_21, %c0_22] : memref<1x128xf32, #tpu.memory_space<vmem>>, vector<1x128xf32>
    %29 = vector.broadcast %28 : vector<1x128xf32> to vector<64x128xf32>
    %30 = arith.addf %27, %29 : vector<64x128xf32>
    %c0_23 = arith.constant 0 : index
    %c0_24 = arith.constant 0 : index
    %31 = vector.load %arg10[%c0_23, %c0_24] : memref<64x128xf32, #tpu.memory_space<vmem>>, vector<64x128xf32>
    tpu.vector_store %arg10[%c0_23, %c0_24], %30 {strides = array<i32>} : memref<64x128xf32, #tpu.memory_space<vmem>>, vector<64x128xf32>,
    return
  }
  func.func @transform_0(%arg0: i32) -> (i32, i32) {
    %c0_i32 = arith.constant 0 : i32
    %c0_i32_0 = arith.constant 0 : i32
    return %arg0, %c0_i32 : i32, i32
  }
  func.func @transform_1(%arg0: i32) -> (i32, i32) {
    %c0_i32 = arith.constant 0 : i32
    %c0_i32_0 = arith.constant 0 : i32
    %c0_i32_1 = arith.constant 0 : i32
    return %c0_i32, %c0_i32_0 : i32, i32
  }
  func.func @transform_2(%arg0: i32) -> (i32, i32) {
    %c0_i32 = arith.constant 0 : i32
    %c0_i32_0 = arith.constant 0 : i32
    %c0_i32_1 = arith.constant 0 : i32
    return %c0_i32, %c0_i32_0 : i32, i32
  }
  func.func @transform_3(%arg0: i32) -> (i32, i32) {
    %c0_i32 = arith.constant 0 : i32
    %c0_i32_0 = arith.constant 0 : i32
    %c0_i32_1 = arith.constant 0 : i32
    return %c0_i32, %c0_i32_0 : i32, i32
  }
  func.func @transform_4(%arg0: i32) -> (i32, i32) {
    %c0_i32 = arith.constant 0 : i32
    %c0_i32_0 = arith.constant 0 : i32
    %c0_i32_1 = arith.constant 0 : i32
    return %c0_i32, %c0_i32_0 : i32, i32
  }
  func.func @transform_5(%arg0: i32) -> (i32, i32) {
    %c0_i32 = arith.constant 0 : i32
    %c0_i32_0 = arith.constant 0 : i32
    %c0_i32_1 = arith.constant 0 : i32
    return %c0_i32, %c0_i32_0 : i32, i32
  }
  func.func @transform_6(%arg0: i32) -> (i32, i32) {
    %c0_i32 = arith.constant 0 : i32
    %c0_i32_0 = arith.constant 0 : i32
    %c0_i32_1 = arith.constant 0 : i32
    return %c0_i32, %c0_i32_0 : i32, i32
  }
  func.func @transform_7(%arg0: i32) -> (i32, i32) {
    %c0_i32 = arith.constant 0 : i32
    %c0_i32_0 = arith.constant 0 : i32
    %c0_i32_1 = arith.constant 0 : i32
    return %c0_i32, %c0_i32_0 : i32, i32
  }
  func.func @transform_8(%arg0: i32) -> (i32, i32) {
    %c0_i32 = arith.constant 0 : i32
    %c0_i32_0 = arith.constant 0 : i32
    %c0_i32_1 = arith.constant 0 : i32
    return %c0_i32, %c0_i32_0 : i32, i32
  }
  func.func @transform_9(%arg0: i32) -> (i32, i32) {
    %c0_i32 = arith.constant 0 : i32
    %c0_i32_0 = arith.constant 0 : i32
    return %arg0, %c0_i32 : i32, i32
  }
}

</mosaic_0001>

<bundles_post_ra>
// kernel: _deep_forward_impl.1
= control target key start
LH: loop header
LB: loop body
LE: loop exit
PB: predicated region body
PF: predicated region fallthrough
CT: control target
= control target key end

     0   :  { %s1965_s1 = inlined_call_operand.vmem [shape: bf16[256,256], index: 1, kind: input, shape index: {}]   ;;  %s1966_s0 = inlined_call_operand.vmem [shape: f32[64,256], index: 0, kind: input, shape index: {}]   ;;  %s1967_s3 = inlined_call_operand.vmem [shape: bf16[256,256], index: 3, kind: input, shape index: {}]   ;;  %s1968_s5 = inlined_call_operand.vmem [shape: bf16[256,256], index: 5, kind: input, shape index: {}]   ;;  %s1969_s2 = inlined_call_operand.vmem [shape: f32[1,256], index: 2, kind: input, shape index: {}]   ;;  %s1970_s7 = inlined_call_operand.vmem [shape: bf16[256,128], index: 7, kind: input, shape index: {}]   ;;  %s1971_s4 = inlined_call_operand.vmem [shape: f32[1,256], index: 4, kind: input, shape index: {}]   ;;  %s1972_s6 = inlined_call_operand.vmem [shape: f32[1,256], index: 6, kind: input, shape index: {}]   ;;  %s1973_s8 = inlined_call_operand.vmem [shape: f32[1,128], index: 8, kind: input, shape index: {}]   ;;  %s1974_s9 = inlined_call_operand.vmem [shape: f32[64,128], index: 9, kind: output, shape index: {}]  }
   0x1   :  { %v1325_v0 = vld [vmem:[%s1965_s1 + $0x4] ss:$8 sps:$4 sm:$0xff]   ;;  %v1327_v1 = vld [vmem:[%s1965_s1] ss:$8 sps:$4 sm:$0xff]   ;;  %v1328_v2 = vld [vmem:[%s1965_s1 + $0x14] ss:$8 sps:$4 sm:$0xff]  }
   0x2   :  { %261 = vmatprep.subr.bf16.mxu0 %v1325_v0  ;;  %v1330_v3 = vld [vmem:[%s1965_s1 + $0x10] ss:$8 sps:$4 sm:$0xff]   ;;  %v1331_v4 = vld [vmem:[%s1965_s1 + $0x24] ss:$8 sps:$4 sm:$0xff]   ;;  %v1333_v5 = vld [vmem:[%s1965_s1 + $0x20] ss:$8 sps:$4 sm:$0xff]  }
   0x3   :  { %262 = vmatpush1.bf16.msra.mxu0 %v1327_v1  ;;  %v1334_v6 = vld [vmem:[%s1965_s1 + $0x34] ss:$8 sps:$4 sm:$0xff]   ;;  %v1336_v7 = vld [vmem:[%s1965_s1 + $0x30] ss:$8 sps:$4 sm:$0xff]   ;;  %v1337_v8 = vld [vmem:[%s1965_s1 + $0x44] ss:$8 sps:$4 sm:$0xff]  }
   0x4   :  { %263 = vmatprep.subr.bf16.mxu0 %v1328_v2  ;;  %v1339_v9 = vld [vmem:[%s1965_s1 + $0x40] ss:$8 sps:$4 sm:$0xff]   ;;  %v1340_v10 = vld [vmem:[%s1965_s1 + $0x54] ss:$8 sps:$4 sm:$0xff]   ;;  %v1342_v11 = vld [vmem:[%s1965_s1 + $0x50] ss:$8 sps:$4 sm:$0xff]  }
   0x5   :  { %v1343_v12 = vld [vmem:[%s1965_s1 + $0x64] ss:$8 sps:$4 sm:$0xff]   ;;  %v36_v14 = vld [vmem:[%s1966_s0 + $0x18] sm:$0xff]  ;;  %v1345_v16 = vld [vmem:[%s1965_s1 + $0x60] ss:$8 sps:$4 sm:$0xff]  }
   0x6   :  { %v34_v13 = vld [vmem:[%s1966_s0 + $0x8] sm:$0xff]  ;;  %v1346_v17 = vld [vmem:[%s1965_s1 + $0x74] ss:$8 sps:$4 sm:$0xff]   ;;  %v1348_v18 = vld [vmem:[%s1965_s1 + $0x70] ss:$8 sps:$4 sm:$0xff]  }
   0x7   :  { %264 = vmatpush1.bf16.msra.mxu0 %v1330_v3  ;;  %v50_v15 = vpack.c.bf16 %v36_v14, %v34_v13  ;;  %v1349_v19 = vld [vmem:[%s1965_s1 + $0x84] ss:$8 sps:$4 sm:$0xff]   ;;  %v1375_v21 = vld [vmem:[%s1967_s3] ss:$8 sps:$4 sm:$0xff]   ;;  %v1376_v22 = vld [vmem:[%s1967_s3 + $0x14] ss:$8 sps:$4 sm:$0xff]  }
   0x8   :  { %265 = vmatprep.subr.bf16.mxu0 %v1331_v4  ;;  %v1373_v20 = vld [vmem:[%s1967_s3 + $0x4] ss:$8 sps:$4 sm:$0xff]   ;;  %v1378_v23 = vld [vmem:[%s1967_s3 + $0x10] ss:$8 sps:$4 sm:$0xff]   ;;  %v1351_v24 = vld [vmem:[%s1965_s1 + $0x80] ss:$8 sps:$4 sm:$0xff]  }
   0x9   :  { %293 = vmatprep.mubr.bf16.mxu0 %v50_v15  ;;  %562 = vmatprep.subr.bf16.mxu1 %v1373_v20  ;;  %v1379_v25 = vld [vmem:[%s1967_s3 + $0x24] ss:$8 sps:$4 sm:$0xff]   ;;  %v1352_v26 = vld [vmem:[%s1965_s1 + $0x94] ss:$8 sps:$4 sm:$0xff]   ;;  %v1381_v27 = vld [vmem:[%s1967_s3 + $0x20] ss:$8 sps:$4 sm:$0xff]  }
   0xa   :  { %563 = vmatpush1.bf16.msra.mxu1 %v1375_v21  ;;  %v1354_v28 = vld [vmem:[%s1965_s1 + $0x90] ss:$8 sps:$4 sm:$0xff]   ;;  %v1382_v29 = vld [vmem:[%s1967_s3 + $0x34] ss:$8 sps:$4 sm:$0xff]   ;;  %v1355_v30 = vld [vmem:[%s1965_s1 + $0xa4] ss:$8 sps:$4 sm:$0xff]  }
   0xb   :  { %266 = vmatpush1.bf16.msra.mxu0 %v1333_v5  ;;  %564 = vmatprep.subr.bf16.mxu1 %v1376_v22  ;;  %v1384_v31 = vld [vmem:[%s1967_s3 + $0x30] ss:$8 sps:$4 sm:$0xff]   ;;  %v1357_v32 = vld [vmem:[%s1965_s1 + $0xa0] ss:$8 sps:$4 sm:$0xff]   ;;  %v1385_v33 = vld [vmem:[%s1967_s3 + $0x44] ss:$8 sps:$4 sm:$0xff]  }
   0xc   :  { %267 = vmatprep.subr.bf16.mxu0 %v1334_v6  ;;  %v1358_v34 = vld [vmem:[%s1965_s1 + $0xb4] ss:$8 sps:$4 sm:$0xff]   ;;  %v1387_v35 = vld [vmem:[%s1967_s3 + $0x40] ss:$8 sps:$4 sm:$0xff]   ;;  %v1360_v36 = vld [vmem:[%s1965_s1 + $0xb0] ss:$8 sps:$4 sm:$0xff]  }
   0xd   :  { %v1388_v37 = vld [vmem:[%s1967_s3 + $0x54] ss:$8 sps:$4 sm:$0xff]   ;;  %v1361_v38 = vld [vmem:[%s1965_s1 + $0xc4] ss:$8 sps:$4 sm:$0xff]   ;;  %v1390_v39 = vld [vmem:[%s1967_s3 + $0x50] ss:$8 sps:$4 sm:$0xff]  }
   0xe   :  { %565 = vmatpush1.bf16.msra.mxu1 %v1378_v23  ;;  %v1363_v40 = vld [vmem:[%s1965_s1 + $0xc0] ss:$8 sps:$4 sm:$0xff]   ;;  %v1391_v41 = vld [vmem:[%s1967_s3 + $0x64] ss:$8 sps:$4 sm:$0xff]   ;;  %v1364_v42 = vld [vmem:[%s1965_s1 + $0xd4] ss:$8 sps:$4 sm:$0xff]  }
   0xf   :  { %268 = vmatpush1.bf16.msra.mxu0 %v1336_v7  ;;  %566 = vmatprep.subr.bf16.mxu1 %v1379_v25  ;;  %v1393_v43 = vld [vmem:[%s1967_s3 + $0x60] ss:$8 sps:$4 sm:$0xff]   ;;  %v1366_v44 = vld [vmem:[%s1965_s1 + $0xd0] ss:$8 sps:$4 sm:$0xff]   ;;  %v1394_v45 = vld [vmem:[%s1967_s3 + $0x74] ss:$8 sps:$4 sm:$0xff]  }
  0x10   :  { %269 = vmatprep.subr.bf16.mxu0 %v1337_v8  ;;  %v1367_v46 = vld [vmem:[%s1965_s1 + $0xe4] ss:$8 sps:$4 sm:$0xff]   ;;  %v1396_v47 = vld [vmem:[%s1967_s3 + $0x70] ss:$8 sps:$4 sm:$0xff]   ;;  %v1369_v48 = vld [vmem:[%s1965_s1 + $0xe0] ss:$8 sps:$4 sm:$0xff]  }
  0x11   :  { %v1397_v49 = vld [vmem:[%s1967_s3 + $0x84] ss:$8 sps:$4 sm:$0xff]   ;;  %v1370_v50 = vld [vmem:[%s1965_s1 + $0xf4] ss:$8 sps:$4 sm:$0xff]   ;;  %v1372_v51 = vld [vmem:[%s1965_s1 + $0xf0] ss:$8 sps:$4 sm:$0xff]  }
  0x12   :  { %567 = vmatpush1.bf16.msra.mxu1 %v1381_v27  ;;  %v1399_v52 = vld [vmem:[%s1967_s3 + $0x80] ss:$8 sps:$4 sm:$0xff]   ;;  %v35_v54 = vld [vmem:[%s1966_s0 + $0x10] sm:$0xff]  ;;  %v40_v57 = vld [vmem:[%s1966_s0 + $0x38] sm:$0xff] }
  0x13   :  { %270 = vmatpush1.bf16.msra.mxu0 %v1339_v9  ;;  %568 = vmatprep.subr.bf16.mxu1 %v1382_v29  ;;  %v33_v53 = vld [vmem:[%s1966_s0] sm:$0xff]  ;;  %v1400_v55 = vld [vmem:[%s1967_s3 + $0x94] ss:$8 sps:$4 sm:$0xff]   ;;  %v38_v56 = vld [vmem:[%s1966_s0 + $0x28] sm:$0xff] }
  0x14   :  { %271 = vmatprep.subr.bf16.mxu0 %v1340_v10  ;;  %v49_v58 = vpack.c.bf16 %v35_v54, %v33_v53  ;;  %v1402_v59 = vld [vmem:[%s1967_s3 + $0x90] ss:$8 sps:$4 sm:$0xff]   ;;  %v52_v60 = vpack.c.bf16 %v40_v57, %v38_v56  ;;  %v1403_v61 = vld [vmem:[%s1967_s3 + $0xa4] ss:$8 sps:$4 sm:$0xff]   ;;  %v1405_v62 = vld [vmem:[%s1967_s3 + $0xa0] ss:$8 sps:$4 sm:$0xff]  }
  0x15   :  { %v37_v63 = vld [vmem:[%s1966_s0 + $0x20] sm:$0xff]  ;;  %v39_v0 = vld [vmem:[%s1966_s0 + $0x30] sm:$0xff]  ;;  %v42_v2 = vld [vmem:[%s1966_s0 + $0x48] sm:$0xff] }
  0x16   :  { %569 = vmatpush1.bf16.msra.mxu1 %v1384_v31  ;;  %v1406_v1 = vld [vmem:[%s1967_s3 + $0xb4] ss:$8 sps:$4 sm:$0xff]   ;;  %v51_v4 = vpack.c.bf16 %v39_v0, %v37_v63  ;;  %v1408_v5 = vld [vmem:[%s1967_s3 + $0xb0] ss:$8 sps:$4 sm:$0xff]   ;;  %v1409_v7 = vld [vmem:[%s1967_s3 + $0xc4] ss:$8 sps:$4 sm:$0xff]  }
  0x17   :  { %272 = vmatpush1.bf16.msra.mxu0 %v1342_v11  ;;  %570 = vmatprep.subr.bf16.mxu1 %v1385_v33  ;;  %v44_v3 = vld [vmem:[%s1966_s0 + $0x58] sm:$0xff]  ;;  %v1411_v8 = vld [vmem:[%s1967_s3 + $0xc0] ss:$8 sps:$4 sm:$0xff]   ;;  %v43_v10 = vld [vmem:[%s1966_s0 + $0x50] sm:$0xff] }
  0x18   :  { %273 = vmatprep.subr.bf16.mxu0 %v1343_v12  ;;  %v54_v6 = vpack.c.bf16 %v44_v3, %v42_v2  ;;  %v41_v9 = vld [vmem:[%s1966_s0 + $0x40] sm:$0xff]  ;;  %v1412_v11 = vld [vmem:[%s1967_s3 + $0xd4] ss:$8 sps:$4 sm:$0xff]   ;;  %v46_v12 = vld [vmem:[%s1966_s0 + $0x68] sm:$0xff] }
  0x19   :  { %v48_v13 = vld [vmem:[%s1966_s0 + $0x78] sm:$0xff]  ;;  %v53_v14 = vpack.c.bf16 %v43_v10, %v41_v9  ;;  %v1415_v20 = vld [vmem:[%s1967_s3 + $0xe4] ss:$8 sps:$4 sm:$0xff]   ;;  %v1417_v21 = vld [vmem:[%s1967_s3 + $0xe0] ss:$8 sps:$4 sm:$0xff]  }
  0x1a   :  { %571 = vmatpush1.bf16.msra.mxu1 %v1387_v35  ;;  %v56_v15 = vpack.c.bf16 %v48_v13, %v46_v12  ;;  %v1418_v22 = vld [vmem:[%s1967_s3 + $0xf4] ss:$8 sps:$4 sm:$0xff]   ;;  %v1420_v23 = vld [vmem:[%s1967_s3 + $0xf0] ss:$8 sps:$4 sm:$0xff]   ;;  %v1423_v25 = vld [vmem:[%s1968_s5 + $0x4] ss:$8 sps:$4 sm:$0xff]  }
  0x1b   :  { %274 = vmatpush1.bf16.msra.mxu0 %v1345_v16  ;;  %572 = vmatprep.subr.bf16.mxu1 %v1388_v37  ;;  %v45_v16 = vld [vmem:[%s1966_s0 + $0x60] sm:$0xff]  ;;  %v1424_v27 = vld [vmem:[%s1968_s5 + $0x10] ss:$8 sps:$4 sm:$0xff]  }
  0x1c   :  { %275 = vmatprep.subr.bf16.mxu0 %v1346_v17  ;;  %v47_v17 = vld [vmem:[%s1966_s0 + $0x70] sm:$0xff]  ;;  %v1427_v29 = vld [vmem:[%s1968_s5 + $0x20] ss:$8 sps:$4 sm:$0xff]  }
  0x1d   :  { %v1430_v31 = vld [vmem:[%s1968_s5 + $0x30] ss:$8 sps:$4 sm:$0xff]   ;;  %v1433_v33 = vld [vmem:[%s1968_s5 + $0x40] ss:$8 sps:$4 sm:$0xff]  }
  0x1e   :  { %573 = vmatpush1.bf16.msra.mxu1 %v1390_v39  ;;  %v1436_v35 = vld [vmem:[%s1968_s5 + $0x50] ss:$8 sps:$4 sm:$0xff]   ;;  %v1439_v37 = vld [vmem:[%s1968_s5 + $0x60] ss:$8 sps:$4 sm:$0xff]  }
  0x1f   :  { %276 = vmatpush1.bf16.msra.mxu0 %v1348_v18  ;;  %574 = vmatprep.subr.bf16.mxu1 %v1391_v41  ;;  %v55_v18 = vpack.c.bf16 %v47_v17, %v45_v16  ;;  %v1442_v39 = vld [vmem:[%s1968_s5 + $0x70] ss:$8 sps:$4 sm:$0xff]   ;;  %v1445_v41 = vld [vmem:[%s1968_s5 + $0x80] ss:$8 sps:$4 sm:$0xff]  }
  0x20   :  { %277 = vmatprep.subr.bf16.mxu0 %v1349_v19  ;;  %v1414_v19 = vld [vmem:[%s1967_s3 + $0xd0] ss:$8 sps:$4 sm:$0xff]  }
  0x22   :  { %575 = vmatpush1.bf16.msra.mxu1 %v1393_v43  ;;  %v1448_v43 = vld [vmem:[%s1968_s5 + $0x90] ss:$8 sps:$4 sm:$0xff]  }
  0x23   :  { %278 = vmatpush1.bf16.msra.mxu0 %v1351_v24  ;;  %576 = vmatprep.subr.bf16.mxu1 %v1394_v45  ;;  %v1421_v24 = vld [vmem:[%s1968_s5] ss:$8 sps:$4 sm:$0xff]  }
  0x24   :  { %279 = vmatprep.subr.bf16.mxu0 %v1352_v26  ;;  %v1426_v26 = vld [vmem:[%s1968_s5 + $0x14] ss:$8 sps:$4 sm:$0xff]   ;;  %v1451_v45 = vld [vmem:[%s1968_s5 + $0xa0] ss:$8 sps:$4 sm:$0xff]  }
  0x26   :  { %577 = vmatpush1.bf16.msra.mxu1 %v1396_v47  ;;  %v1454_v47 = vld [vmem:[%s1968_s5 + $0xb0] ss:$8 sps:$4 sm:$0xff]  }
  0x27   :  { %280 = vmatpush1.bf16.msra.mxu0 %v1354_v28  ;;  %578 = vmatprep.subr.bf16.mxu1 %v1397_v49  ;;  %v1429_v28 = vld [vmem:[%s1968_s5 + $0x24] ss:$8 sps:$4 sm:$0xff]   ;;  %v1457_v49 = vld [vmem:[%s1968_s5 + $0xc0] ss:$8 sps:$4 sm:$0xff]  }
  0x28   :  { %281 = vmatprep.subr.bf16.mxu0 %v1355_v30  ;;  %v1432_v30 = vld [vmem:[%s1968_s5 + $0x34] ss:$8 sps:$4 sm:$0xff]  }
  0x2a   :  { %579 = vmatpush1.bf16.msra.mxu1 %v1399_v52  ;;  %v91_v52 = vlaneseq }
  0x2b   :  { %282 = vmatpush1.bf16.msra.mxu0 %v1357_v32  ;;  %580 = vmatprep.subr.bf16.mxu1 %v1400_v55  ;;  %v1435_v32 = vld [vmem:[%s1968_s5 + $0x44] ss:$8 sps:$4 sm:$0xff]   ;;  %v89_v55 = vld [vmem:[%s1969_s2] sm:$0x3] }
  0x2c   :  { %283 = vmatprep.subr.bf16.mxu0 %v1358_v34  ;;  %v1438_v34 = vld [vmem:[%s1968_s5 + $0x54] ss:$8 sps:$4 sm:$0xff]   ;;  %v92_v53 = vshrl.u32 %v91_v52, 7  ;;  %v1463_v52 = vld [vmem:[%s1968_s5 + $0xe0] ss:$8 sps:$4 sm:$0xff]  }
  0x2e   :  { %581 = vmatpush1.bf16.msra.mxu1 %v1402_v59  ;;  %v1859_v54 = vsub.s32 0, %v92_v53  ;;  %v1864_v56 = vsub.s32 1, %v92_v53  ;;  %v1468_v53 = vld [vmem:[%s1968_s5 + $0xf4] ss:$8 sps:$4 sm:$0xff]  }
  0x2f   :  { %284 = vmatpush1.bf16.msra.mxu0 %v1360_v36  ;;  %582 = vmatprep.subr.bf16.mxu1 %v1403_v61  ;;  %v1441_v36 = vld [vmem:[%s1968_s5 + $0x64] ss:$8 sps:$4 sm:$0xff]  }
  0x30   :  { %285 = vmatprep.subr.bf16.mxu0 %v1361_v38  ;;  %v1444_v38 = vld [vmem:[%s1968_s5 + $0x74] ss:$8 sps:$4 sm:$0xff]   ;;  %v94_v57 = vrot.slane %v89_v55, %v1859_v54 }
  0x32   :  { %583 = vmatpush1.bf16.msra.mxu1 %v1405_v62 }
  0x33   :  { %286 = vmatpush1.bf16.msra.mxu0 %v1363_v40  ;;  %584 = vmatprep.subr.bf16.mxu1 %v1406_v1  ;;  %v1447_v40 = vld [vmem:[%s1968_s5 + $0x84] ss:$8 sps:$4 sm:$0xff]  }
  0x34   :  { %287 = vmatprep.subr.bf16.mxu0 %v1364_v42  ;;  %v1450_v42 = vld [vmem:[%s1968_s5 + $0x94] ss:$8 sps:$4 sm:$0xff]  }
  0x36   :  { %585 = vmatpush1.bf16.msra.mxu1 %v1408_v5 }
  0x37   :  { %288 = vmatpush1.bf16.msra.mxu0 %v1366_v44  ;;  %586 = vmatprep.subr.bf16.mxu1 %v1409_v7  ;;  %v1453_v44 = vld [vmem:[%s1968_s5 + $0xa4] ss:$8 sps:$4 sm:$0xff]  }
  0x38   :  { %289 = vmatprep.subr.bf16.mxu0 %v1367_v46  ;;  %v1456_v46 = vld [vmem:[%s1968_s5 + $0xb4] ss:$8 sps:$4 sm:$0xff]  }
  0x3a   :  { %587 = vmatpush1.bf16.msra.mxu1 %v1411_v8 }
  0x3b   :  { %290 = vmatpush1.bf16.msra.mxu0 %v1369_v48  ;;  %588 = vmatprep.subr.bf16.mxu1 %v1412_v11  ;;  %v1459_v48 = vld [vmem:[%s1968_s5 + $0xc4] ss:$8 sps:$4 sm:$0xff]  }
  0x3c   :  { %291 = vmatprep.subr.bf16.mxu0 %v1370_v50  ;;  %v1462_v50 = vld [vmem:[%s1968_s5 + $0xd4] ss:$8 sps:$4 sm:$0xff]  }
  0x3e   :  { %589 = vmatpush1.bf16.msra.mxu1 %v1414_v19 }
  0x3f   :  { %292 = vmatpush1.bf16.msra.mxu0 %v1372_v51  ;;  %590 = vmatprep.subr.bf16.mxu1 %v1415_v20  ;;  %v1460_v51 = vld [vmem:[%s1968_s5 + $0xd0] ss:$8 sps:$4 sm:$0xff]  }
  0x40   :  { %863 = vmatprep.subr.bf16.mxu0 %v1423_v25 }
  0x42   :  { %294 = vmatmul.mubr.bf16.vlgmr.msra.gmra.mrb[0].mxu0 %v49_v58  ;;  %591 = vmatpush1.bf16.msra.mxu1 %v1417_v21  ;;  %v98_v58 = vrot.slane %v89_v55, %v1864_v56  ;;  %v1466_v55 = vld [vmem:[%s1968_s5 + $0xf0] ss:$8 sps:$4 sm:$0xff]  }
  0x43   :  { %303 = vmatprep.mubr.bf16.mxu0 %v52_v60  ;;  %592 = vmatprep.subr.bf16.mxu1 %v1418_v22 }
  0x44   :  { %864 = vmatpush1.bf16.msra.mxu0 %v1421_v24 }
  0x45   :  { %865 = vmatprep.subr.bf16.mxu0 %v1426_v26 }
  0x46   :  { %593 = vmatpush1.bf16.msra.mxu1 %v1420_v23 }
  0x48   :  { %866 = vmatpush1.bf16.msra.mxu0 %v1424_v27 }
  0x49   :  { %867 = vmatprep.subr.bf16.mxu0 %v1429_v28 }
  0x4a   :  { %304 = vmatmul.mubr.bf16.gmra.mrb[4].mxu0 %v51_v4 }
  0x4b   :  { %313 = vmatprep.mubr.bf16.mxu0 %v54_v6 }
  0x4c   :  { %868 = vmatpush1.bf16.msra.mxu0 %v1427_v29 }
  0x4d   :  { %869 = vmatprep.subr.bf16.mxu0 %v1432_v30 }
  0x50   :  { %870 = vmatpush1.bf16.msra.mxu0 %v1430_v31 }
  0x51   :  { %871 = vmatprep.subr.bf16.mxu0 %v1435_v32 }
  0x52   :  { %314 = vmatmul.mubr.bf16.gmra.mrb[8].mxu0 %v53_v14 }
  0x53   :  { %323 = vmatprep.mubr.bf16.mxu0 %v56_v15 }
  0x54   :  { %872 = vmatpush1.bf16.msra.mxu0 %v1433_v33 }
  0x55   :  { %873 = vmatprep.subr.bf16.mxu0 %v1438_v34 }
  0x58   :  { %874 = vmatpush1.bf16.msra.mxu0 %v1436_v35 }
  0x59   :  { %875 = vmatprep.subr.bf16.mxu0 %v1441_v36 }
  0x5a   :  { %324 = vmatmul.mubr.bf16.gmra.mrb[12].mxu0 %v55_v18 }
  0x5c   :  { %876 = vmatpush1.bf16.msra.mxu0 %v1439_v37 }
  0x5d   :  { %877 = vmatprep.subr.bf16.mxu0 %v1444_v38 }
  0x60   :  { %878 = vmatpush1.bf16.msra.mxu0 %v1442_v39 }
  0x61   :  { %879 = vmatprep.subr.bf16.mxu0 %v1447_v40 }
  0x64   :  { %880 = vmatpush1.bf16.msra.mxu0 %v1445_v41 }
  0x65   :  { %881 = vmatprep.subr.bf16.mxu0 %v1450_v42 }
  0x68   :  { %882 = vmatpush1.bf16.msra.mxu0 %v1448_v43 }
  0x69   :  { %883 = vmatprep.subr.bf16.mxu0 %v1453_v44 }
  0x6c   :  { %884 = vmatpush1.bf16.msra.mxu0 %v1451_v45 }
  0x6d   :  { %885 = vmatprep.subr.bf16.mxu0 %v1456_v46 }
  0x70   :  { %886 = vmatpush1.bf16.msra.mxu0 %v1454_v47 }
  0x71   :  { %887 = vmatprep.subr.bf16.mxu0 %v1459_v48 }
  0x74   :  { %888 = vmatpush1.bf16.msra.mxu0 %v1457_v49 }
  0x75   :  { %889 = vmatprep.subr.bf16.mxu0 %v1462_v50 }
  0x78   :  { %890 = vmatpush1.bf16.msra.mxu0 %v1460_v51  ;;  %v1465_v51 = vld [vmem:[%s1968_s5 + $0xe4] ss:$8 sps:$4 sm:$0xff]  }
  0x79   :  { %891 = vmatprep.subr.bf16.mxu0 %v1465_v51 }
  0x7c   :  { %892 = vmatpush1.bf16.msra.mxu0 %v1463_v52 }
  0x7d   :  { %893 = vmatprep.subr.bf16.mxu0 %v1468_v53 }
  0x80   :  { %894 = vmatpush1.bf16.msra.mxu0 %v1466_v55 }
 0x115   :  { %v295_v59 = vpop.f32.mrb[0].mxu0 }
 0x116   :  { %v296_v60 = vadd.f32 %v295_v59, %v94_v57  ;;  %v297_v61 = vpop.f32.mrb[1].mxu0  ;;  %v1471_v59 = vld [vmem:[%s1970_s7 + $0x48] sm:$0xff]  }
 0x117   :  { %v298_v62 = vadd.f32 %v297_v61, %v98_v58  ;;  %v299_v63 = vpop.f32.mrb[2].mxu0  ;;  %v1473_v61 = vld [vmem:[%s1970_s7 + $0x50] sm:$0xff]  }
 0x118   :  { %v300_v0 = vadd.f32 %v299_v63, %v94_v57  ;;  %v301_v1 = vpop.f32.mrb[3].mxu0  ;;  %v334_v3 = vmax.f32 %v296_v60, 0.0  ;;  %v1472_v60 = vld [vmem:[%s1970_s7 + $0x8] sm:$0xff]   ;;  %v1475_v63 = vld [vmem:[%s1970_s7 + $0x58] sm:$0xff]  }
 0x119   :  { %v302_v2 = vadd.f32 %v301_v1, %v98_v58  ;;  %v335_v5 = vmax.f32 %v298_v62, 0.0  ;;  %v1474_v62 = vld [vmem:[%s1970_s7 + $0x10] sm:$0xff]   ;;  %v1477_v1 = vld [vmem:[%s1970_s7 + $0x60] sm:$0xff]  }
 0x11a   :  { %v336_v4 = vmax.f32 %v300_v0, 0.0  ;;  %v1476_v0 = vld [vmem:[%s1970_s7 + $0x18] sm:$0xff]  }
 0x11b   :  { %v337_v6 = vmax.f32 %v302_v2, 0.0  ;;  %v1478_v2 = vld [vmem:[%s1970_s7 + $0x20] sm:$0xff]  }
 0x11c   :  { %v350_v7 = vpack.c.bf16 %v336_v4, %v334_v3  ;;  %v1479_v3 = vld [vmem:[%s1970_s7 + $0x68] sm:$0xff]  }
 0x11d   :  { %v305_v8 = vpop.f32.mrb[4].mxu0  ;;  %v351_v9 = vpack.c.bf16 %v337_v6, %v335_v5  ;;  %v1480_v4 = vld [vmem:[%s1970_s7 + $0x28] sm:$0xff]   ;;  %v390_v5 = vld [vmem:[%s1971_s4] sm:$0x3] }
 0x11e   :  { %v306_v10 = vadd.f32 %v305_v8, %v94_v57  ;;  %v307_v11 = vpop.f32.mrb[5].mxu0  ;;  %v395_v6 = vrot.slane %v390_v5, %v1859_v54 }
 0x11f   :  { %v308_v12 = vadd.f32 %v307_v11, %v98_v58  ;;  %v309_v13 = vpop.f32.mrb[6].mxu0  ;;  %594 = vmatprep.mubr.bf16.mxu1 %v351_v9 }
 0x120   :  { %v310_v14 = vadd.f32 %v309_v13, %v94_v57  ;;  %v311_v15 = vpop.f32.mrb[7].mxu0  ;;  %595 = vmatmul.mubr.bf16.vlgmr.msra.gmra.mrb[0].mxu1 %v350_v7  ;;  %v338_v17 = vmax.f32 %v306_v10, 0.0  ;;  %v399_v7 = vrot.slane %v390_v5, %v1864_v56  ;;  %v1484_v5 = vld [vmem:[%s1970_s7 + $0x38] sm:$0xff]  }
 0x121   :  { %v312_v16 = vadd.f32 %v311_v15, %v98_v58  ;;  %v339_v19 = vmax.f32 %v308_v12, 0.0 }
 0x122   :  { %v340_v18 = vmax.f32 %v310_v14, 0.0 }
 0x123   :  { %v341_v20 = vmax.f32 %v312_v16, 0.0 }
 0x124   :  { %v352_v21 = vpack.c.bf16 %v340_v18, %v338_v17 }
 0x125   :  { %v353_v22 = vpack.c.bf16 %v341_v20, %v339_v19  ;;  %v315_v23 = vpop.f32.mrb[8].mxu0 }
 0x126   :  { %v316_v24 = vadd.f32 %v315_v23, %v94_v57  ;;  %v317_v25 = vpop.f32.mrb[9].mxu0 }
 0x127   :  { %v318_v26 = vadd.f32 %v317_v25, %v98_v58  ;;  %v319_v27 = vpop.f32.mrb[10].mxu0  ;;  %604 = vmatprep.mubr.bf16.mxu1 %v353_v22 }
 0x128   :  { %v320_v28 = vadd.f32 %v319_v27, %v94_v57  ;;  %v321_v29 = vpop.f32.mrb[11].mxu0  ;;  %605 = vmatmul.mubr.bf16.gmra.mrb[4].mxu1 %v352_v21  ;;  %v342_v31 = vmax.f32 %v316_v24, 0.0 }
 0x129   :  { %v322_v30 = vadd.f32 %v321_v29, %v98_v58  ;;  %v343_v33 = vmax.f32 %v318_v26, 0.0 }
 0x12a   :  { %v344_v32 = vmax.f32 %v320_v28, 0.0 }
 0x12b   :  { %v345_v34 = vmax.f32 %v322_v30, 0.0 }
 0x12c   :  { %v354_v35 = vpack.c.bf16 %v344_v32, %v342_v31 }
 0x12d   :  { %v355_v36 = vpack.c.bf16 %v345_v34, %v343_v33  ;;  %v325_v37 = vpop.f32.mrb[12].mxu0 }
 0x12e   :  { %v326_v38 = vadd.f32 %v325_v37, %v94_v57  ;;  %v327_v39 = vpop.f32.mrb[13].mxu0 }
 0x12f   :  { %v328_v40 = vadd.f32 %v327_v39, %v98_v58  ;;  %v329_v41 = vpop.f32.mrb[14].mxu0  ;;  %614 = vmatprep.mubr.bf16.mxu1 %v355_v36 }
 0x130   :  { %v330_v42 = vadd.f32 %v329_v41, %v94_v57  ;;  %v331_v43 = vpop.f32.mrb[15].mxu0  ;;  %615 = vmatmul.mubr.bf16.gmra.mrb[8].mxu1 %v354_v35  ;;  %v346_v45 = vmax.f32 %v326_v38, 0.0  ;;  %v1469_v57 = vld [vmem:[%s1970_s7 + $0x40] sm:$0xff]  }
 0x131   :  { %v332_v44 = vadd.f32 %v331_v43, %v98_v58  ;;  %v347_v47 = vmax.f32 %v328_v40, 0.0  ;;  %v1470_v58 = vld [vmem:[%s1970_s7] sm:$0xff]   ;;  %1285 = vmatprep.subr.bf16.mxu1 %v1469_v57 }
 0x132   :  { %v348_v46 = vmax.f32 %v330_v42, 0.0  ;;  %1286 = vmatpush3.bf16.msra.mxu1 %v1470_v58 }
 0x133   :  { %v349_v48 = vmax.f32 %v332_v44, 0.0  ;;  %1287 = vmatprep.subr.bf16.mxu1 %v1471_v59 }
 0x134   :  { %v356_v49 = vpack.c.bf16 %v348_v46, %v346_v45 }
 0x135   :  { %v357_v50 = vpack.c.bf16 %v349_v48, %v347_v47 }
 0x136   :  { %1288 = vmatpush3.bf16.msra.mxu1 %v1472_v60 }
 0x137   :  { %624 = vmatprep.mubr.bf16.mxu1 %v357_v50  ;;  %1289 = vmatprep.subr.bf16.mxu1 %v1473_v61 }
 0x138   :  { %625 = vmatmul.mubr.bf16.gmra.mrb[12].mxu1 %v356_v49 }
 0x13a   :  { %1290 = vmatpush3.bf16.msra.mxu1 %v1474_v62 }
 0x13b   :  { %1291 = vmatprep.subr.bf16.mxu1 %v1475_v63 }
 0x13e   :  { %1292 = vmatpush3.bf16.msra.mxu1 %v1476_v0 }
 0x13f   :  { %1293 = vmatprep.subr.bf16.mxu1 %v1477_v1 }
 0x142   :  { %1294 = vmatpush3.bf16.msra.mxu1 %v1478_v2  ;;  %v1481_v2 = vld [vmem:[%s1970_s7 + $0x70] sm:$0xff]  }
 0x143   :  { %1295 = vmatprep.subr.bf16.mxu1 %v1479_v3  ;;  %v1482_v3 = vld [vmem:[%s1970_s7 + $0x30] sm:$0xff]  }
 0x146   :  { %1296 = vmatpush3.bf16.msra.mxu1 %v1480_v4  ;;  %v1483_v4 = vld [vmem:[%s1970_s7 + $0x78] sm:$0xff]  }
 0x147   :  { %1297 = vmatprep.subr.bf16.mxu1 %v1481_v2  ;;  %v1268_v2 = vld [vmem:[%s1973_s8] ss:$0 sm:$0xff] }
 0x14a   :  { %1298 = vmatpush3.bf16.msra.mxu1 %v1482_v3 }
 0x14b   :  { %1299 = vmatprep.subr.bf16.mxu1 %v1483_v4 }
 0x14e   :  { %1300 = vmatpush3.bf16.msra.mxu1 %v1484_v5 }
 0x1f3   :  { %v596_v8 = vpop.f32.mrb[0].mxu1 }
 0x1f4   :  { %v597_v9 = vadd.f32 %v596_v8, %v395_v6  ;;  %v598_v10 = vpop.f32.mrb[1].mxu1 }
 0x1f5   :  { %v599_v11 = vadd.f32 %v598_v10, %v399_v7  ;;  %v600_v12 = vpop.f32.mrb[2].mxu1 }
 0x1f6   :  { %v601_v13 = vadd.f32 %v600_v12, %v395_v6  ;;  %v602_v14 = vpop.f32.mrb[3].mxu1  ;;  %v635_v16 = vmax.f32 %v597_v9, 0.0 }
 0x1f7   :  { %v603_v15 = vadd.f32 %v602_v14, %v399_v7  ;;  %v636_v18 = vmax.f32 %v599_v11, 0.0 }
 0x1f8   :  { %v637_v17 = vmax.f32 %v601_v13, 0.0 }
 0x1f9   :  { %v638_v19 = vmax.f32 %v603_v15, 0.0 }
 0x1fa   :  { %v651_v20 = vpack.c.bf16 %v637_v17, %v635_v16 }
 0x1fb   :  { %v652_v21 = vpack.c.bf16 %v638_v19, %v636_v18  ;;  %v606_v22 = vpop.f32.mrb[4].mxu1 }
 0x1fc   :  { %v607_v23 = vadd.f32 %v606_v22, %v395_v6  ;;  %v608_v24 = vpop.f32.mrb[5].mxu1 }
 0x1fd   :  { %v609_v25 = vadd.f32 %v608_v24, %v399_v7  ;;  %v610_v26 = vpop.f32.mrb[6].mxu1  ;;  %895 = vmatprep.mubr.bf16.mxu0 %v652_v21 }
 0x1fe   :  { %v611_v27 = vadd.f32 %v610_v26, %v395_v6  ;;  %v612_v28 = vpop.f32.mrb[7].mxu1  ;;  %896 = vmatmul.mubr.bf16.vlgmr.msra.gmra.mrb[16].mxu0 %v651_v20  ;;  %v639_v30 = vmax.f32 %v607_v23, 0.0 }
 0x1ff   :  { %v613_v29 = vadd.f32 %v612_v28, %v399_v7  ;;  %v640_v32 = vmax.f32 %v609_v25, 0.0 }
 0x200   :  { %v641_v31 = vmax.f32 %v611_v27, 0.0 }
 0x201   :  { %v642_v33 = vmax.f32 %v613_v29, 0.0 }
 0x202   :  { %v653_v34 = vpack.c.bf16 %v641_v31, %v639_v30 }
 0x203   :  { %v654_v35 = vpack.c.bf16 %v642_v33, %v640_v32  ;;  %v616_v36 = vpop.f32.mrb[8].mxu1 }
 0x204   :  { %v617_v37 = vadd.f32 %v616_v36, %v395_v6  ;;  %v618_v38 = vpop.f32.mrb[9].mxu1 }
 0x205   :  { %v619_v39 = vadd.f32 %v618_v38, %v399_v7  ;;  %v620_v40 = vpop.f32.mrb[10].mxu1  ;;  %905 = vmatprep.mubr.bf16.mxu0 %v654_v35 }
 0x206   :  { %v621_v41 = vadd.f32 %v620_v40, %v395_v6  ;;  %v622_v42 = vpop.f32.mrb[11].mxu1  ;;  %906 = vmatmul.mubr.bf16.gmra.mrb[20].mxu0 %v653_v34  ;;  %v643_v44 = vmax.f32 %v617_v37, 0.0 }
 0x207   :  { %v623_v43 = vadd.f32 %v622_v42, %v399_v7  ;;  %v644_v46 = vmax.f32 %v619_v39, 0.0 }
 0x208   :  { %v645_v45 = vmax.f32 %v621_v41, 0.0 }
 0x209   :  { %v646_v47 = vmax.f32 %v623_v43, 0.0 }
 0x20a   :  { %v655_v48 = vpack.c.bf16 %v645_v45, %v643_v44 }
 0x20b   :  { %v656_v49 = vpack.c.bf16 %v646_v47, %v644_v46  ;;  %v626_v50 = vpop.f32.mrb[12].mxu1 }
 0x20c   :  { %v627_v51 = vadd.f32 %v626_v50, %v395_v6  ;;  %v628_v52 = vpop.f32.mrb[13].mxu1 }
 0x20d   :  { %v629_v53 = vadd.f32 %v628_v52, %v399_v7  ;;  %v630_v55 = vpop.f32.mrb[14].mxu1  ;;  %915 = vmatprep.mubr.bf16.mxu0 %v656_v49 }
 0x20e   :  { %v631_v57 = vadd.f32 %v630_v55, %v395_v6  ;;  %v632_v58 = vpop.f32.mrb[15].mxu1  ;;  %916 = vmatmul.mubr.bf16.gmra.mrb[24].mxu0 %v655_v48  ;;  %v647_v60 = vmax.f32 %v627_v51, 0.0  ;;  %v691_v6 = vld [vmem:[%s1972_s6] sm:$0x3] }
 0x20f   :  { %v633_v59 = vadd.f32 %v632_v58, %v399_v7  ;;  %v648_v62 = vmax.f32 %v629_v53, 0.0  ;;  %v696_v7 = vrot.slane %v691_v6, %v1859_v54  ;;  %v700_v8 = vrot.slane %v691_v6, %v1864_v56 }
 0x210   :  { %v649_v61 = vmax.f32 %v631_v57, 0.0 }
 0x211   :  { %v650_v63 = vmax.f32 %v633_v59, 0.0 }
 0x212   :  { %v657_v0 = vpack.c.bf16 %v649_v61, %v647_v60 }
 0x213   :  { %v658_v1 = vpack.c.bf16 %v650_v63, %v648_v62 }
 0x215   :  { %925 = vmatprep.mubr.bf16.mxu0 %v658_v1 }
 0x216   :  { %926 = vmatmul.mubr.bf16.gmra.mrb[28].mxu0 %v657_v0 }
 0x2d1   :  { %v897_v9 = vpop.f32.mrb[16].mxu0 }
 0x2d2   :  { %v898_v10 = vadd.f32 %v897_v9, %v696_v7  ;;  %v899_v11 = vpop.f32.mrb[17].mxu0 }
 0x2d3   :  { %v900_v12 = vadd.f32 %v899_v11, %v700_v8  ;;  %v901_v13 = vpop.f32.mrb[18].mxu0 }
 0x2d4   :  { %v902_v14 = vadd.f32 %v901_v13, %v696_v7  ;;  %v903_v15 = vpop.f32.mrb[19].mxu0  ;;  %v936_v17 = vmax.f32 %v898_v10, 0.0 }
 0x2d5   :  { %v904_v16 = vadd.f32 %v903_v15, %v700_v8  ;;  %v937_v19 = vmax.f32 %v900_v12, 0.0 }
 0x2d6   :  { %v938_v18 = vmax.f32 %v902_v14, 0.0 }
 0x2d7   :  { %v939_v20 = vmax.f32 %v904_v16, 0.0 }
 0x2d8   :  { %v952_v21 = vpack.c.bf16 %v938_v18, %v936_v17 }
 0x2d9   :  { %v953_v22 = vpack.c.bf16 %v939_v20, %v937_v19  ;;  %v907_v23 = vpop.f32.mrb[20].mxu0 }
 0x2da   :  { %v908_v24 = vadd.f32 %v907_v23, %v696_v7  ;;  %v909_v25 = vpop.f32.mrb[21].mxu0 }
 0x2db   :  { %v910_v54 = vadd.f32 %v909_v25, %v700_v8  ;;  %v911_v26 = vpop.f32.mrb[22].mxu0  ;;  %1127 = vmatprep.mubr.bf16.mxu1 %v953_v22 }
 0x2dc   :  { %v912_v56 = vadd.f32 %v911_v26, %v696_v7  ;;  %v913_v27 = vpop.f32.mrb[23].mxu0  ;;  %1128 = vmatmul.mubr.bf16.vlgmr.msra.gmra.mrb[16].mxu1 %v952_v21  ;;  %v940_v29 = vmax.f32 %v908_v24, 0.0 }
 0x2dd   :  { %v914_v28 = vadd.f32 %v913_v27, %v700_v8  ;;  %v941_v31 = vmax.f32 %v910_v54, 0.0 }
 0x2de   :  { %v942_v30 = vmax.f32 %v912_v56, 0.0 }
 0x2df   :  { %v943_v32 = vmax.f32 %v914_v28, 0.0 }
 0x2e0   :  { %v954_v33 = vpack.c.bf16 %v942_v30, %v940_v29 }
 0x2e1   :  { %v955_v34 = vpack.c.bf16 %v943_v32, %v941_v31  ;;  %v917_v35 = vpop.f32.mrb[24].mxu0 }
 0x2e2   :  { %v918_v36 = vadd.f32 %v917_v35, %v696_v7  ;;  %v919_v37 = vpop.f32.mrb[25].mxu0 }
 0x2e3   :  { %v920_v38 = vadd.f32 %v919_v37, %v700_v8  ;;  %v921_v39 = vpop.f32.mrb[26].mxu0  ;;  %1135 = vmatprep.mubr.bf16.mxu1 %v955_v34 }
 0x2e4   :  { %v922_v40 = vadd.f32 %v921_v39, %v696_v7  ;;  %v923_v41 = vpop.f32.mrb[27].mxu0  ;;  %1136 = vmatmul.mubr.bf16.gmra.mrb[20].mxu1 %v954_v33  ;;  %v944_v43 = vmax.f32 %v918_v36, 0.0 }
 0x2e5   :  { %v924_v42 = vadd.f32 %v923_v41, %v700_v8  ;;  %v945_v45 = vmax.f32 %v920_v38, 0.0 }
 0x2e6   :  { %v946_v44 = vmax.f32 %v922_v40, 0.0 }
 0x2e7   :  { %v947_v46 = vmax.f32 %v924_v42, 0.0 }
 0x2e8   :  { %v956_v47 = vpack.c.bf16 %v946_v44, %v944_v43 }
 0x2e9   :  { %v957_v48 = vpack.c.bf16 %v947_v46, %v945_v45  ;;  %v927_v49 = vpop.f32.mrb[28].mxu0 }
 0x2ea   :  { %v928_v50 = vadd.f32 %v927_v49, %v696_v7  ;;  %v929_v51 = vpop.f32.mrb[29].mxu0 }
 0x2eb   :  { %v930_v52 = vadd.f32 %v929_v51, %v700_v8  ;;  %v931_v53 = vpop.f32.mrb[30].mxu0  ;;  %1143 = vmatprep.mubr.bf16.mxu1 %v957_v48 }
 0x2ec   :  { %v932_v55 = vadd.f32 %v931_v53, %v696_v7  ;;  %v933_v57 = vpop.f32.mrb[31].mxu0  ;;  %1144 = vmatmul.mubr.bf16.gmra.mrb[24].mxu1 %v956_v47  ;;  %v948_v59 = vmax.f32 %v928_v50, 0.0 }
 0x2ed   :  { %v934_v58 = vadd.f32 %v933_v57, %v700_v8  ;;  %v949_v61 = vmax.f32 %v930_v52, 0.0 }
 0x2ee   :  { %v950_v60 = vmax.f32 %v932_v55, 0.0 }
 0x2ef   :  { %v951_v62 = vmax.f32 %v934_v58, 0.0 }
 0x2f0   :  { %v958_v63 = vpack.c.bf16 %v950_v60, %v948_v59 }
 0x2f1   :  { %v959_v0 = vpack.c.bf16 %v951_v62, %v949_v61 }
 0x2f3   :  { %1151 = vmatprep.mubr.bf16.mxu1 %v959_v0 }
 0x2f4   :  { %1152 = vmatmul.mubr.bf16.gmra.mrb[28].mxu1 %v958_v63 }
 0x3af   :  { %v1301_v1 = vpop.f32.mrb[16].mxu1 }
 0x3b0   :  { %v1302_v3 = vpop.f32.mrb[17].mxu1 }
 0x3b1   :  { %v1303_v4 = vadd.f32 %v1302_v3, %v1301_v1  ;;  %v1304_v5 = vpop.f32.mrb[18].mxu1 }
 0x3b2   :  { %v1305_v6 = vpop.f32.mrb[19].mxu1 }
 0x3b3   :  { %v1130_v7 = vadd.f32 %v1303_v4, %v1268_v2  ;;  %v1306_v9 = vadd.f32 %v1305_v6, %v1304_v5 }
 0x3b5   :  { %1160 = vst [vmem:[%s1974_s9] sm:$0xff] %v1130_v7  ;;  %v1133_v8 = vadd.f32 %v1306_v9, %v1268_v2 }
 0x3b7   :  { %1161 = vst [vmem:[%s1974_s9 + $0x8] sm:$0xff] %v1133_v8  ;;  %v1307_v10 = vpop.f32.mrb[20].mxu1 }
 0x3b8   :  { %v1308_v11 = vpop.f32.mrb[21].mxu1 }
 0x3b9   :  { %v1309_v12 = vadd.f32 %v1308_v11, %v1307_v10  ;;  %v1310_v13 = vpop.f32.mrb[22].mxu1 }
 0x3ba   :  { %v1311_v14 = vpop.f32.mrb[23].mxu1 }
 0x3bb   :  { %v1138_v15 = vadd.f32 %v1309_v12, %v1268_v2  ;;  %v1312_v16 = vadd.f32 %v1311_v14, %v1310_v13 }
 0x3bd   :  { %1162 = vst [vmem:[%s1974_s9 + $0x10] sm:$0xff] %v1138_v15  ;;  %v1141_v17 = vadd.f32 %v1312_v16, %v1268_v2 }
 0x3bf   :  { %1163 = vst [vmem:[%s1974_s9 + $0x18] sm:$0xff] %v1141_v17  ;;  %v1313_v18 = vpop.f32.mrb[24].mxu1 }
 0x3c0   :  { %v1314_v19 = vpop.f32.mrb[25].mxu1 }
 0x3c1   :  { %v1315_v20 = vadd.f32 %v1314_v19, %v1313_v18  ;;  %v1316_v21 = vpop.f32.mrb[26].mxu1 }
 0x3c2   :  { %v1317_v22 = vpop.f32.mrb[27].mxu1 }
 0x3c3   :  { %v1146_v23 = vadd.f32 %v1315_v20, %v1268_v2  ;;  %v1318_v24 = vadd.f32 %v1317_v22, %v1316_v21 }
 0x3c5   :  { %1164 = vst [vmem:[%s1974_s9 + $0x20] sm:$0xff] %v1146_v23  ;;  %v1149_v25 = vadd.f32 %v1318_v24, %v1268_v2 }
 0x3c7   :  { %1165 = vst [vmem:[%s1974_s9 + $0x28] sm:$0xff] %v1149_v25  ;;  %v1319_v54 = vpop.f32.mrb[28].mxu1 }
 0x3c8   :  { %v1320_v26 = vpop.f32.mrb[29].mxu1 }
 0x3c9   :  { %v1321_v56 = vadd.f32 %v1320_v26, %v1319_v54  ;;  %v1322_v27 = vpop.f32.mrb[30].mxu1 }
 0x3ca   :  { %v1323_v28 = vpop.f32.mrb[31].mxu1 }
 0x3cb   :  { %v1154_v29 = vadd.f32 %v1321_v56, %v1268_v2  ;;  %v1324_v30 = vadd.f32 %v1323_v28, %v1322_v27 }
 0x3cd   :  { %1166 = vst [vmem:[%s1974_s9 + $0x30] sm:$0xff] %v1154_v29  ;;  %v1157_v31 = vadd.f32 %v1324_v30, %v1268_v2 }
 0x3cf   :  { %1167 = vst [vmem:[%s1974_s9 + $0x38] sm:$0xff] %v1157_v31 }

</bundles_post_ra>
